<compile_context>
chip_gen: v7x
topology: tpu7x:2x2x1
jax: 0.10.0
libtpu: 0.0.40
codegen_flags: <defaults>
</compile_context>

<pallas_src>
from functools import partial

import jax
import jax.numpy as jnp
from jax.experimental import pallas as pl
from jax.experimental.pallas import tpu as pltpu


def gru_head_kernel(x_ref, wi_ref, wh_ref, brzn_ref, bhn_ref, wlin_ref, blin_ref,
                    out_ref, hid_ref, *, batch, seq_len, hidden):
    """GRU recurrence + linear head + clamp + broadcast-min, single invocation.

    x_ref    : (T*B, I)  VMEM f32   time-major flattened input (wrapper-prepped)
    wi_ref   : (I, 3H)   VMEM bf16  fused input weights, gate order r|z|n
    wh_ref   : (H, 3H)   VMEM bf16  fused hidden weights, gate order r|z|n
    brzn_ref : (1, 3H)   VMEM f32   [b_ir+b_hr | b_iz+b_hz | b_in]
    bhn_ref  : (1, H)    VMEM f32   b_hn (stays inside r * (.))
    wlin_ref : (H, 1)    VMEM bf16  linear head weight (transposed), O == 1
    blin_ref : (1, 1)    VMEM f32
    out_ref  : (T*B, I)  VMEM f32
    hid_ref  : (T*B, H)  VMEM f32   scratch: hidden-state history
    """
    B, T, H = batch, seq_len, hidden

    # ---- Hoisted loads / broadcasts (nothing repeated inside the loop). ----
    x_all = x_ref[...]                                   # (T*B, I) f32, kept for min()
    x_bf = x_all.astype(jnp.bfloat16)
    wi = wi_ref[...]                                     # (I, 3H) bf16
    wh = wh_ref[...]                                     # (H, 3H) bf16
    wlin = wlin_ref[...]                                 # (H, 1)  bf16
    blin = blin_ref[...]                                 # (1, 1)  f32
    bhn = jnp.broadcast_to(bhn_ref[...], (B, H))         # hoisted broadcast

    # ---- Input projection for all timesteps: ONE fused matmul + ONE bias add. ----
    gx = jnp.dot(x_bf, wi, preferred_element_type=jnp.float32) + brzn_ref[...]  # (T*B, 3H)
    # Split gates once (hoisted) so the loop body only does sublane row slices.
    gx_r = gx[:, 0:H]
    gx_z = gx[:, H:2 * H]
    gx_n = gx[:, 2 * H:3 * H]

    # ---- Serial recurrence: h in vregs, one fused (H,3H) matmul per step,
    #      hidden history written to VMEM scratch (bounded vreg pressure). ----
    h = jnp.zeros((B, H), jnp.float32)                   # h_0 = 0 (PyTorch passes None)
    for t in range(T):                                   # T small -> statically unrolled
        # TODO(synk): for large T switch to lax.fori_loop(..., unroll=k) with
        # pl.ds-indexed reads of a gx scratch to keep compile time / code size bounded.
        gh = jnp.dot(h.astype(jnp.bfloat16), wh,
                     preferred_element_type=jnp.float32)                    # (B, 3H)
        r = jax.nn.sigmoid(gx_r[t * B:(t + 1) * B, :] + gh[:, 0:H])
        z = jax.nn.sigmoid(gx_z[t * B:(t + 1) * B, :] + gh[:, H:2 * H])
        n = jnp.tanh(gx_n[t * B:(t + 1) * B, :] + r * (gh[:, 2 * H:3 * H] + bhn))
        h = (1.0 - z) * n + z * h
        hid_ref[pl.ds(t * B, B), :] = h

    # ---- Head: linear + clamp + broadcast-min, one lane-dense output store. ----
    hid = hid_ref[...].astype(jnp.bfloat16)                                  # (T*B, H)
    y = jnp.dot(hid, wlin, preferred_element_type=jnp.float32) + blin        # (T*B, 1)
    pred = jnp.maximum(y, 0.0)                                               # clamp(min=0)
    out_ref[...] = jnp.minimum(pred, x_all)                                  # (T*B, I)


def pack_params(params):
    """One-time packing: transpose, fuse gates/biases, cast MXU operands to bf16."""
    H = params["w_hh"].shape[1]
    w_ih, w_hh = params["w_ih"], params["w_hh"]          # (3H, I), (3H, H), rows r|z|n
    b_ih, b_hh = params["b_ih"], params["b_hh"]          # (3H,), (3H,)

    w_i_cat = jnp.asarray(w_ih.T, jnp.bfloat16)          # (I, 3H)
    w_h_cat = jnp.asarray(w_hh.T, jnp.bfloat16)          # (H, 3H)
    b_rzn = jnp.concatenate([
        b_ih[:2 * H] + b_hh[:2 * H],                     # r, z biases pre-summed
        b_ih[2 * H:],                                    # n: input bias only
    ]).reshape(1, 3 * H).astype(jnp.float32)
    b_hn = jnp.asarray(b_hh[2 * H:].reshape(1, H), jnp.float32)
    w_lin = jnp.asarray(params["w_lin"].T, jnp.bfloat16)     # (H, O)
    b_lin = jnp.asarray(params["b_lin"].reshape(1, -1), jnp.float32)
    return (w_i_cat, w_h_cat, b_rzn, b_hn, w_lin, b_lin)


@jax.jit
def custom_rnn_forward(x, packed):
    wi, wh, brzn, bhn, wlin, blin = packed
    B, T, I = x.shape
    H = wh.shape[0]
    assert wlin.shape[1] == 1, (
        "kernel assumes output_size == 1 (the .view(B,-1,1) + torch.min broadcast "
        "against x only makes sense for O == 1)")

    # Wrapper-side layout prep (free-ish XLA ops, avoids in-kernel relayouts):
    # time-major rows so per-step access is a contiguous sublane slice.
    x_tm = jnp.transpose(x, (1, 0, 2)).reshape(T * B, I)

    vmem = pl.BlockSpec(memory_space=pltpu.MemorySpace.VMEM)
    out_tm = pl.pallas_call(
        partial(gru_head_kernel, batch=B, seq_len=T, hidden=H),
        out_shape=jax.ShapeDtypeStruct((T * B, I), jnp.float32),
        in_specs=[vmem] * 7,
        out_specs=vmem,
        scratch_shapes=[pltpu.VMEM((T * B, H), jnp.float32)],   # hidden-state history
        compiler_params=pltpu.CompilerParams(vmem_limit_bytes=32 * 1024 * 1024),
    )(x_tm, wi, wh, brzn, bhn, wlin, blin)

    # TODO(synk): on v7x (2 TensorCores), once B*T*H is large enough to amortize the
    # ~0.35us/step grid overhead, pass x as (T, B, I), add grid=(n_blocks,) blocking the
    # batch axis with dimension_semantics=("parallel",), and tile gx / hid over the grid
    # to stay inside the 64 MiB VMEM; not worth it at these toy shapes (and no gain on
    # the single-TC v5e/v6e).
    return out_tm.reshape(T, B, I).transpose(1, 0, 2)


def reference_forward(x, params):
    """Pure-JAX f32 reference of the PyTorch forward (for validation)."""
    B, T, I = x.shape
    H = params["w_hh"].shape[1]
    h = jnp.zeros((B, H), jnp.float32)
    preds = []
    for t in range(T):
        x_t = x[:, t, :]
        gx = x_t @ params["w_ih"].T + params["b_ih"]
        gh = h @ params["w_hh"].T + params["b_hh"]
        r = jax.nn.sigmoid(gx[:, :H] + gh[:, :H])
        z = jax.nn.sigmoid(gx[:, H:2 * H] + gh[:, H:2 * H])
        n = jnp.tanh(gx[:, 2 * H:] + r * gh[:, 2 * H:])
        h = (1.0 - z) * n + z * h
        preds.append(h)
    hid = jnp.stack(preds, axis=1)                            # (B, T, H)
    pred = hid @ params["w_lin"].T + params["b_lin"]          # (B, T, O)
    pred = pred.reshape(B, -1, 1)                             # (B, T*O, 1), O=1
    pred = jnp.maximum(pred, 0.0)
    pred = jnp.minimum(pred, x)                               # broadcast -> (B, T, I)
    return pred


def init_params(key, input_size, hidden_size, output_size):
    """Deterministic init mirroring PyTorch default U(-1/sqrt(H), 1/sqrt(H))."""
    ks = jax.random.split(key, 6)
    k = 1.0 / jnp.sqrt(hidden_size)
    u = lambda kk, shape: jax.random.uniform(kk, shape, jnp.float32, -k, k)
    return {
        "w_ih": u(ks[0], (3 * hidden_size, input_size)),
        "w_hh": u(ks[1], (3 * hidden_size, hidden_size)),
        "b_ih": u(ks[2], (3 * hidden_size,)),
        "b_hh": u(ks[3], (3 * hidden_size,)),
        "w_lin": u(ks[4], (output_size, hidden_size)),
        "b_lin": u(ks[5], (output_size,)),
    }


if __name__ == "__main__":
    B, T, I, H, O = 2, 8, 4, 32, 1   # output_size=1 so torch.min broadcast is valid

    key = jax.random.PRNGKey(0)
    kx, kp = jax.random.split(key)
    x = jax.random.uniform(kx, (B, T, I), jnp.float32)
    params = init_params(kp, I, H, O)

    packed = pack_params(params)     # one-time weight packing (not per forward)

    out = custom_rnn_forward(x, packed)
    out = jax.block_until_ready(out)

    ref = reference_forward(x, params)
    assert out.shape == (B, T, I)
    # bf16 MXU operands (f32 accumulation / f32 elementwise) -> loosened tolerance
    # vs. the pure-f32 reference, per the perf review.
    assert jnp.allclose(out, ref, atol=5e-2, rtol=5e-2), "mismatch vs reference"

    print("KERNEL_OK")
</pallas_src>

<mosaic_0001>
module attributes {stable_mosaic.version = 11 : i64} {
  func.func @gru_head_kernel(%arg0: memref<16x4xf32, #tpu.memory_space<vmem>>, %arg1: memref<4x96xbf16, #tpu.memory_space<vmem>>, %arg2: memref<32x96xbf16, #tpu.memory_space<vmem>>, %arg3: memref<1x96xf32, #tpu.memory_space<vmem>>, %arg4: memref<1x32xf32, #tpu.memory_space<vmem>>, %arg5: memref<32x1xbf16, #tpu.memory_space<vmem>>, %arg6: memref<1x1xf32, #tpu.memory_space<vmem>>, %arg7: memref<16x4xf32, #tpu.memory_space<vmem>>, %arg8: memref<16x32xf32, #tpu.memory_space<vmem>>) attributes {dimension_semantics = [], scalar_prefetch = 0 : i64, scratch_operands = 1 : i64, tpu.core_type = #tpu.core_type<tc>} {
    %c0 = arith.constant 0 : index
    %c0_0 = arith.constant 0 : index
    %0 = vector.load %arg0[%c0, %c0_0] : memref<16x4xf32, #tpu.memory_space<vmem>>, vector<16x4xf32>
    %1 = arith.truncf %0 : vector<16x4xf32> to vector<16x4xbf16>
    %c0_1 = arith.constant 0 : index
    %c0_2 = arith.constant 0 : index
    %2 = vector.load %arg1[%c0_1, %c0_2] : memref<4x96xbf16, #tpu.memory_space<vmem>>, vector<4x96xbf16>
    %c0_3 = arith.constant 0 : index
    %c0_4 = arith.constant 0 : index
    %3 = vector.load %arg2[%c0_3, %c0_4] : memref<32x96xbf16, #tpu.memory_space<vmem>>, vector<32x96xbf16>
    %c0_5 = arith.constant 0 : index
    %c0_6 = arith.constant 0 : index
    %4 = vector.load %arg5[%c0_5, %c0_6] : memref<32x1xbf16, #tpu.memory_space<vmem>>, vector<32x1xbf16>
    %c0_7 = arith.constant 0 : index
    %c0_8 = arith.constant 0 : index
    %5 = vector.load %arg6[%c0_7, %c0_8] : memref<1x1xf32, #tpu.memory_space<vmem>>, vector<1x1xf32>
    %c0_9 = arith.constant 0 : index
    %c0_10 = arith.constant 0 : index
    %6 = vector.load %arg4[%c0_9, %c0_10] : memref<1x32xf32, #tpu.memory_space<vmem>>, vector<1x32xf32>
    %7 = vector.shape_cast %6 : vector<1x32xf32> to vector<1x32xf32>
    %8 = vector.broadcast %7 : vector<1x32xf32> to vector<2x32xf32>
    %cst = arith.constant dense<0.000000e+00> : vector<16x96xf32>
    %9 = tpu.matmul %1, %2, %cst {dimension_numbers = #tpu.dot_dimension_numbers<[1], [0], [0], [1], [0, 0, 1, 1], [], []>} : vector<16x4xbf16>, vector<4x96xbf16>, vector<16x96xf32> -> vector<16x96xf32>
    %c0_11 = arith.constant 0 : index
    %c0_12 = arith.constant 0 : index
    %10 = vector.load %arg3[%c0_11, %c0_12] : memref<1x96xf32, #tpu.memory_space<vmem>>, vector<1x96xf32>
    %11 = vector.broadcast %10 : vector<1x96xf32> to vector<16x96xf32>
    %12 = arith.addf %9, %11 : vector<16x96xf32>
    %13 = vector.extract_strided_slice %12 {offsets = [0, 0], sizes = [16, 32], strides = [1, 1]} : vector<16x96xf32> to vector<16x32xf32>
    %14 = vector.extract_strided_slice %12 {offsets = [0, 32], sizes = [16, 32], strides = [1, 1]} : vector<16x96xf32> to vector<16x32xf32>
    %15 = vector.extract_strided_slice %12 {offsets = [0, 64], sizes = [16, 32], strides = [1, 1]} : vector<16x96xf32> to vector<16x32xf32>
    %cst_13 = arith.constant 0.000000e+00 : f32
    %16 = vector.broadcast %cst_13 : f32 to vector<2x32xf32>
    %17 = arith.truncf %16 : vector<2x32xf32> to vector<2x32xbf16>
    %cst_14 = arith.constant dense<0.000000e+00> : vector<2x96xf32>
    %18 = tpu.matmul %17, %3, %cst_14 {dimension_numbers = #tpu.dot_dimension_numbers<[1], [0], [0], [1], [0, 0, 1, 1], [], []>} : vector<2x32xbf16>, vector<32x96xbf16>, vector<2x96xf32> -> vector<2x96xf32>
    %19 = vector.extract_strided_slice %13 {offsets = [0, 0], sizes = [2, 32], strides = [1, 1]} : vector<16x32xf32> to vector<2x32xf32>
    %20 = vector.extract_strided_slice %18 {offsets = [0, 0], sizes = [2, 32], strides = [1, 1]} : vector<2x96xf32> to vector<2x32xf32>
    %21 = arith.addf %19, %20 : vector<2x32xf32>
    %22 = arith.negf %21 : vector<2x32xf32>
    %23 = math.exp %22 : vector<2x32xf32>
    %cst_15 = arith.constant 1.000000e+00 : f32
    %24 = vector.broadcast %cst_15 : f32 to vector<2x32xf32>
    %25 = arith.addf %24, %23 : vector<2x32xf32>
    %26 = arith.divf %24, %25 : vector<2x32xf32>
    %27 = vector.extract_strided_slice %14 {offsets = [0, 0], sizes = [2, 32], strides = [1, 1]} : vector<16x32xf32> to vector<2x32xf32>
    %28 = vector.extract_strided_slice %18 {offsets = [0, 32], sizes = [2, 32], strides = [1, 1]} : vector<2x96xf32> to vector<2x32xf32>
    %29 = arith.addf %27, %28 : vector<2x32xf32>
    %30 = arith.negf %29 : vector<2x32xf32>
    %31 = math.exp %30 : vector<2x32xf32>
    %cst_16 = arith.constant 1.000000e+00 : f32
    %32 = vector.broadcast %cst_16 : f32 to vector<2x32xf32>
    %33 = arith.addf %32, %31 : vector<2x32xf32>
    %34 = arith.divf %32, %33 : vector<2x32xf32>
    %35 = vector.extract_strided_slice %15 {offsets = [0, 0], sizes = [2, 32], strides = [1, 1]} : vector<16x32xf32> to vector<2x32xf32>
    %36 = vector.extract_strided_slice %18 {offsets = [0, 64], sizes = [2, 32], strides = [1, 1]} : vector<2x96xf32> to vector<2x32xf32>
    %37 = arith.addf %36, %8 : vector<2x32xf32>
    %38 = arith.mulf %26, %37 : vector<2x32xf32>
    %39 = arith.addf %35, %38 : vector<2x32xf32>
    %40 = math.tanh %39 : vector<2x32xf32>
    %cst_17 = arith.constant 1.000000e+00 : f32
    %41 = vector.broadcast %cst_17 : f32 to vector<2x32xf32>
    %42 = arith.subf %41, %34 : vector<2x32xf32>
    %43 = arith.mulf %42, %40 : vector<2x32xf32>
    %44 = arith.mulf %34, %16 : vector<2x32xf32>
    %45 = arith.addf %43, %44 : vector<2x32xf32>
    %c0_18 = arith.constant 0 : index
    %c0_19 = arith.constant 0 : index
    %46 = vector.load %arg8[%c0_18, %c0_19] : memref<16x32xf32, #tpu.memory_space<vmem>>, vector<2x32xf32>
    tpu.vector_store %arg8[%c0_18, %c0_19], %45 {strides = array<i32>} : memref<16x32xf32, #tpu.memory_space<vmem>>, vector<2x32xf32>,
    %47 = arith.truncf %45 : vector<2x32xf32> to vector<2x32xbf16>
    %cst_20 = arith.constant dense<0.000000e+00> : vector<2x96xf32>
    %48 = tpu.matmul %47, %3, %cst_20 {dimension_numbers = #tpu.dot_dimension_numbers<[1], [0], [0], [1], [0, 0, 1, 1], [], []>} : vector<2x32xbf16>, vector<32x96xbf16>, vector<2x96xf32> -> vector<2x96xf32>
    %49 = vector.extract_strided_slice %13 {offsets = [2, 0], sizes = [2, 32], strides = [1, 1]} : vector<16x32xf32> to vector<2x32xf32>
    %50 = vector.extract_strided_slice %48 {offsets = [0, 0], sizes = [2, 32], strides = [1, 1]} : vector<2x96xf32> to vector<2x32xf32>
    %51 = arith.addf %49, %50 : vector<2x32xf32>
    %52 = arith.negf %51 : vector<2x32xf32>
    %53 = math.exp %52 : vector<2x32xf32>
    %cst_21 = arith.constant 1.000000e+00 : f32
    %54 = vector.broadcast %cst_21 : f32 to vector<2x32xf32>
    %55 = arith.addf %54, %53 : vector<2x32xf32>
    %56 = arith.divf %54, %55 : vector<2x32xf32>
    %57 = vector.extract_strided_slice %14 {offsets = [2, 0], sizes = [2, 32], strides = [1, 1]} : vector<16x32xf32> to vector<2x32xf32>
    %58 = vector.extract_strided_slice %48 {offsets = [0, 32], sizes = [2, 32], strides = [1, 1]} : vector<2x96xf32> to vector<2x32xf32>
    %59 = arith.addf %57, %58 : vector<2x32xf32>
    %60 = arith.negf %59 : vector<2x32xf32>
    %61 = math.exp %60 : vector<2x32xf32>
    %cst_22 = arith.constant 1.000000e+00 : f32
    %62 = vector.broadcast %cst_22 : f32 to vector<2x32xf32>
    %63 = arith.addf %62, %61 : vector<2x32xf32>
    %64 = arith.divf %62, %63 : vector<2x32xf32>
    %65 = vector.extract_strided_slice %15 {offsets = [2, 0], sizes = [2, 32], strides = [1, 1]} : vector<16x32xf32> to vector<2x32xf32>
    %66 = vector.extract_strided_slice %48 {offsets = [0, 64], sizes = [2, 32], strides = [1, 1]} : vector<2x96xf32> to vector<2x32xf32>
    %67 = arith.addf %66, %8 : vector<2x32xf32>
    %68 = arith.mulf %56, %67 : vector<2x32xf32>
    %69 = arith.addf %65, %68 : vector<2x32xf32>
    %70 = math.tanh %69 : vector<2x32xf32>
    %cst_23 = arith.constant 1.000000e+00 : f32
    %71 = vector.broadcast %cst_23 : f32 to vector<2x32xf32>
    %72 = arith.subf %71, %64 : vector<2x32xf32>
    %73 = arith.mulf %72, %70 : vector<2x32xf32>
    %74 = arith.mulf %64, %45 : vector<2x32xf32>
    %75 = arith.addf %73, %74 : vector<2x32xf32>
    %c2 = arith.constant 2 : index
    %c0_24 = arith.constant 0 : index
    %76 = vector.load %arg8[%c2, %c0_24] : memref<16x32xf32, #tpu.memory_space<vmem>>, vector<2x32xf32>
    tpu.vector_store %arg8[%c2, %c0_24], %75 {strides = array<i32>} : memref<16x32xf32, #tpu.memory_space<vmem>>, vector<2x32xf32>,
    %77 = arith.truncf %75 : vector<2x32xf32> to vector<2x32xbf16>
    %cst_25 = arith.constant dense<0.000000e+00> : vector<2x96xf32>
    %78 = tpu.matmul %77, %3, %cst_25 {dimension_numbers = #tpu.dot_dimension_numbers<[1], [0], [0], [1], [0, 0, 1, 1], [], []>} : vector<2x32xbf16>, vector<32x96xbf16>, vector<2x96xf32> -> vector<2x96xf32>
    %79 = vector.extract_strided_slice %13 {offsets = [4, 0], sizes = [2, 32], strides = [1, 1]} : vector<16x32xf32> to vector<2x32xf32>
    %80 = vector.extract_strided_slice %78 {offsets = [0, 0], sizes = [2, 32], strides = [1, 1]} : vector<2x96xf32> to vector<2x32xf32>
    %81 = arith.addf %79, %80 : vector<2x32xf32>
    %82 = arith.negf %81 : vector<2x32xf32>
    %83 = math.exp %82 : vector<2x32xf32>
    %cst_26 = arith.constant 1.000000e+00 : f32
    %84 = vector.broadcast %cst_26 : f32 to vector<2x32xf32>
    %85 = arith.addf %84, %83 : vector<2x32xf32>
    %86 = arith.divf %84, %85 : vector<2x32xf32>
    %87 = vector.extract_strided_slice %14 {offsets = [4, 0], sizes = [2, 32], strides = [1, 1]} : vector<16x32xf32> to vector<2x32xf32>
    %88 = vector.extract_strided_slice %78 {offsets = [0, 32], sizes = [2, 32], strides = [1, 1]} : vector<2x96xf32> to vector<2x32xf32>
    %89 = arith.addf %87, %88 : vector<2x32xf32>
    %90 = arith.negf %89 : vector<2x32xf32>
    %91 = math.exp %90 : vector<2x32xf32>
    %cst_27 = arith.constant 1.000000e+00 : f32
    %92 = vector.broadcast %cst_27 : f32 to vector<2x32xf32>
    %93 = arith.addf %92, %91 : vector<2x32xf32>
    %94 = arith.divf %92, %93 : vector<2x32xf32>
    %95 = vector.extract_strided_slice %15 {offsets = [4, 0], sizes = [2, 32], strides = [1, 1]} : vector<16x32xf32> to vector<2x32xf32>
    %96 = vector.extract_strided_slice %78 {offsets = [0, 64], sizes = [2, 32], strides = [1, 1]} : vector<2x96xf32> to vector<2x32xf32>
    %97 = arith.addf %96, %8 : vector<2x32xf32>
    %98 = arith.mulf %86, %97 : vector<2x32xf32>
    %99 = arith.addf %95, %98 : vector<2x32xf32>
    %100 = math.tanh %99 : vector<2x32xf32>
    %cst_28 = arith.constant 1.000000e+00 : f32
    %101 = vector.broadcast %cst_28 : f32 to vector<2x32xf32>
    %102 = arith.subf %101, %94 : vector<2x32xf32>
    %103 = arith.mulf %102, %100 : vector<2x32xf32>
    %104 = arith.mulf %94, %75 : vector<2x32xf32>
    %105 = arith.addf %103, %104 : vector<2x32xf32>
    %c4 = arith.constant 4 : index
    %c0_29 = arith.constant 0 : index
    %106 = vector.load %arg8[%c4, %c0_29] : memref<16x32xf32, #tpu.memory_space<vmem>>, vector<2x32xf32>
    tpu.vector_store %arg8[%c4, %c0_29], %105 {strides = array<i32>} : memref<16x32xf32, #tpu.memory_space<vmem>>, vector<2x32xf32>,
    %107 = arith.truncf %105 : vector<2x32xf32> to vector<2x32xbf16>
    %cst_30 = arith.constant dense<0.000000e+00> : vector<2x96xf32>
    %108 = tpu.matmul %107, %3, %cst_30 {dimension_numbers = #tpu.dot_dimension_numbers<[1], [0], [0], [1], [0, 0, 1, 1], [], []>} : vector<2x32xbf16>, vector<32x96xbf16>, vector<2x96xf32> -> vector<2x96xf32>
    %109 = vector.extract_strided_slice %13 {offsets = [6, 0], sizes = [2, 32], strides = [1, 1]} : vector<16x32xf32> to vector<2x32xf32>
    %110 = vector.extract_strided_slice %108 {offsets = [0, 0], sizes = [2, 32], strides = [1, 1]} : vector<2x96xf32> to vector<2x32xf32>
    %111 = arith.addf %109, %110 : vector<2x32xf32>
    %112 = arith.negf %111 : vector<2x32xf32>
    %113 = math.exp %112 : vector<2x32xf32>
    %cst_31 = arith.constant 1.000000e+00 : f32
    %114 = vector.broadcast %cst_31 : f32 to vector<2x32xf32>
    %115 = arith.addf %114, %113 : vector<2x32xf32>
    %116 = arith.divf %114, %115 : vector<2x32xf32>
    %117 = vector.extract_strided_slice %14 {offsets = [6, 0], sizes = [2, 32], strides = [1, 1]} : vector<16x32xf32> to vector<2x32xf32>
    %118 = vector.extract_strided_slice %108 {offsets = [0, 32], sizes = [2, 32], strides = [1, 1]} : vector<2x96xf32> to vector<2x32xf32>
    %119 = arith.addf %117, %118 : vector<2x32xf32>
    %120 = arith.negf %119 : vector<2x32xf32>
    %121 = math.exp %120 : vector<2x32xf32>
    %cst_32 = arith.constant 1.000000e+00 : f32
    %122 = vector.broadcast %cst_32 : f32 to vector<2x32xf32>
    %123 = arith.addf %122, %121 : vector<2x32xf32>
    %124 = arith.divf %122, %123 : vector<2x32xf32>
    %125 = vector.extract_strided_slice %15 {offsets = [6, 0], sizes = [2, 32], strides = [1, 1]} : vector<16x32xf32> to vector<2x32xf32>
    %126 = vector.extract_strided_slice %108 {offsets = [0, 64], sizes = [2, 32], strides = [1, 1]} : vector<2x96xf32> to vector<2x32xf32>
    %127 = arith.addf %126, %8 : vector<2x32xf32>
    %128 = arith.mulf %116, %127 : vector<2x32xf32>
    %129 = arith.addf %125, %128 : vector<2x32xf32>
    %130 = math.tanh %129 : vector<2x32xf32>
    %cst_33 = arith.constant 1.000000e+00 : f32
    %131 = vector.broadcast %cst_33 : f32 to vector<2x32xf32>
    %132 = arith.subf %131, %124 : vector<2x32xf32>
    %133 = arith.mulf %132, %130 : vector<2x32xf32>
    %134 = arith.mulf %124, %105 : vector<2x32xf32>
    %135 = arith.addf %133, %134 : vector<2x32xf32>
    %c6 = arith.constant 6 : index
    %c0_34 = arith.constant 0 : index
    %136 = vector.load %arg8[%c6, %c0_34] : memref<16x32xf32, #tpu.memory_space<vmem>>, vector<2x32xf32>
    tpu.vector_store %arg8[%c6, %c0_34], %135 {strides = array<i32>} : memref<16x32xf32, #tpu.memory_space<vmem>>, vector<2x32xf32>,
    %137 = arith.truncf %135 : vector<2x32xf32> to vector<2x32xbf16>
    %cst_35 = arith.constant dense<0.000000e+00> : vector<2x96xf32>
    %138 = tpu.matmul %137, %3, %cst_35 {dimension_numbers = #tpu.dot_dimension_numbers<[1], [0], [0], [1], [0, 0, 1, 1], [], []>} : vector<2x32xbf16>, vector<32x96xbf16>, vector<2x96xf32> -> vector<2x96xf32>
    %139 = vector.extract_strided_slice %13 {offsets = [8, 0], sizes = [2, 32], strides = [1, 1]} : vector<16x32xf32> to vector<2x32xf32>
    %140 = vector.extract_strided_slice %138 {offsets = [0, 0], sizes = [2, 32], strides = [1, 1]} : vector<2x96xf32> to vector<2x32xf32>
    %141 = arith.addf %139, %140 : vector<2x32xf32>
    %142 = arith.negf %141 : vector<2x32xf32>
    %143 = math.exp %142 : vector<2x32xf32>
    %cst_36 = arith.constant 1.000000e+00 : f32
    %144 = vector.broadcast %cst_36 : f32 to vector<2x32xf32>
    %145 = arith.addf %144, %143 : vector<2x32xf32>
    %146 = arith.divf %144, %145 : vector<2x32xf32>
    %147 = vector.extract_strided_slice %14 {offsets = [8, 0], sizes = [2, 32], strides = [1, 1]} : vector<16x32xf32> to vector<2x32xf32>
    %148 = vector.extract_strided_slice %138 {offsets = [0, 32], sizes = [2, 32], strides = [1, 1]} : vector<2x96xf32> to vector<2x32xf32>
    %149 = arith.addf %147, %148 : vector<2x32xf32>
    %150 = arith.negf %149 : vector<2x32xf32>
    %151 = math.exp %150 : vector<2x32xf32>
    %cst_37 = arith.constant 1.000000e+00 : f32
    %152 = vector.broadcast %cst_37 : f32 to vector<2x32xf32>
    %153 = arith.addf %152, %151 : vector<2x32xf32>
    %154 = arith.divf %152, %153 : vector<2x32xf32>
    %155 = vector.extract_strided_slice %15 {offsets = [8, 0], sizes = [2, 32], strides = [1, 1]} : vector<16x32xf32> to vector<2x32xf32>
    %156 = vector.extract_strided_slice %138 {offsets = [0, 64], sizes = [2, 32], strides = [1, 1]} : vector<2x96xf32> to vector<2x32xf32>
    %157 = arith.addf %156, %8 : vector<2x32xf32>
    %158 = arith.mulf %146, %157 : vector<2x32xf32>
    %159 = arith.addf %155, %158 : vector<2x32xf32>
    %160 = math.tanh %159 : vector<2x32xf32>
    %cst_38 = arith.constant 1.000000e+00 : f32
    %161 = vector.broadcast %cst_38 : f32 to vector<2x32xf32>
    %162 = arith.subf %161, %154 : vector<2x32xf32>
    %163 = arith.mulf %162, %160 : vector<2x32xf32>
    %164 = arith.mulf %154, %135 : vector<2x32xf32>
    %165 = arith.addf %163, %164 : vector<2x32xf32>
    %c8 = arith.constant 8 : index
    %c0_39 = arith.constant 0 : index
    %166 = vector.load %arg8[%c8, %c0_39] : memref<16x32xf32, #tpu.memory_space<vmem>>, vector<2x32xf32>
    tpu.vector_store %arg8[%c8, %c0_39], %165 {strides = array<i32>} : memref<16x32xf32, #tpu.memory_space<vmem>>, vector<2x32xf32>,
    %167 = arith.truncf %165 : vector<2x32xf32> to vector<2x32xbf16>
    %cst_40 = arith.constant dense<0.000000e+00> : vector<2x96xf32>
    %168 = tpu.matmul %167, %3, %cst_40 {dimension_numbers = #tpu.dot_dimension_numbers<[1], [0], [0], [1], [0, 0, 1, 1], [], []>} : vector<2x32xbf16>, vector<32x96xbf16>, vector<2x96xf32> -> vector<2x96xf32>
    %169 = vector.extract_strided_slice %13 {offsets = [10, 0], sizes = [2, 32], strides = [1, 1]} : vector<16x32xf32> to vector<2x32xf32>
    %170 = vector.extract_strided_slice %168 {offsets = [0, 0], sizes = [2, 32], strides = [1, 1]} : vector<2x96xf32> to vector<2x32xf32>
    %171 = arith.addf %169, %170 : vector<2x32xf32>
    %172 = arith.negf %171 : vector<2x32xf32>
    %173 = math.exp %172 : vector<2x32xf32>
    %cst_41 = arith.constant 1.000000e+00 : f32
    %174 = vector.broadcast %cst_41 : f32 to vector<2x32xf32>
    %175 = arith.addf %174, %173 : vector<2x32xf32>
    %176 = arith.divf %174, %175 : vector<2x32xf32>
    %177 = vector.extract_strided_slice %14 {offsets = [10, 0], sizes = [2, 32], strides = [1, 1]} : vector<16x32xf32> to vector<2x32xf32>
    %178 = vector.extract_strided_slice %168 {offsets = [0, 32], sizes = [2, 32], strides = [1, 1]} : vector<2x96xf32> to vector<2x32xf32>
    %179 = arith.addf %177, %178 : vector<2x32xf32>
    %180 = arith.negf %179 : vector<2x32xf32>
    %181 = math.exp %180 : vector<2x32xf32>
    %cst_42 = arith.constant 1.000000e+00 : f32
    %182 = vector.broadcast %cst_42 : f32 to vector<2x32xf32>
    %183 = arith.addf %182, %181 : vector<2x32xf32>
    %184 = arith.divf %182, %183 : vector<2x32xf32>
    %185 = vector.extract_strided_slice %15 {offsets = [10, 0], sizes = [2, 32], strides = [1, 1]} : vector<16x32xf32> to vector<2x32xf32>
    %186 = vector.extract_strided_slice %168 {offsets = [0, 64], sizes = [2, 32], strides = [1, 1]} : vector<2x96xf32> to vector<2x32xf32>
    %187 = arith.addf %186, %8 : vector<2x32xf32>
    %188 = arith.mulf %176, %187 : vector<2x32xf32>
    %189 = arith.addf %185, %188 : vector<2x32xf32>
    %190 = math.tanh %189 : vector<2x32xf32>
    %cst_43 = arith.constant 1.000000e+00 : f32
    %191 = vector.broadcast %cst_43 : f32 to vector<2x32xf32>
    %192 = arith.subf %191, %184 : vector<2x32xf32>
    %193 = arith.mulf %192, %190 : vector<2x32xf32>
    %194 = arith.mulf %184, %165 : vector<2x32xf32>
    %195 = arith.addf %193, %194 : vector<2x32xf32>
    %c10 = arith.constant 10 : index
    %c0_44 = arith.constant 0 : index
    %196 = vector.load %arg8[%c10, %c0_44] : memref<16x32xf32, #tpu.memory_space<vmem>>, vector<2x32xf32>
    tpu.vector_store %arg8[%c10, %c0_44], %195 {strides = array<i32>} : memref<16x32xf32, #tpu.memory_space<vmem>>, vector<2x32xf32>,
    %197 = arith.truncf %195 : vector<2x32xf32> to vector<2x32xbf16>
    %cst_45 = arith.constant dense<0.000000e+00> : vector<2x96xf32>
    %198 = tpu.matmul %197, %3, %cst_45 {dimension_numbers = #tpu.dot_dimension_numbers<[1], [0], [0], [1], [0, 0, 1, 1], [], []>} : vector<2x32xbf16>, vector<32x96xbf16>, vector<2x96xf32> -> vector<2x96xf32>
    %199 = vector.extract_strided_slice %13 {offsets = [12, 0], sizes = [2, 32], strides = [1, 1]} : vector<16x32xf32> to vector<2x32xf32>
    %200 = vector.extract_strided_slice %198 {offsets = [0, 0], sizes = [2, 32], strides = [1, 1]} : vector<2x96xf32> to vector<2x32xf32>
    %201 = arith.addf %199, %200 : vector<2x32xf32>
    %202 = arith.negf %201 : vector<2x32xf32>
    %203 = math.exp %202 : vector<2x32xf32>
    %cst_46 = arith.constant 1.000000e+00 : f32
    %204 = vector.broadcast %cst_46 : f32 to vector<2x32xf32>
    %205 = arith.addf %204, %203 : vector<2x32xf32>
    %206 = arith.divf %204, %205 : vector<2x32xf32>
    %207 = vector.extract_strided_slice %14 {offsets = [12, 0], sizes = [2, 32], strides = [1, 1]} : vector<16x32xf32> to vector<2x32xf32>
    %208 = vector.extract_strided_slice %198 {offsets = [0, 32], sizes = [2, 32], strides = [1, 1]} : vector<2x96xf32> to vector<2x32xf32>
    %209 = arith.addf %207, %208 : vector<2x32xf32>
    %210 = arith.negf %209 : vector<2x32xf32>
    %211 = math.exp %210 : vector<2x32xf32>
    %cst_47 = arith.constant 1.000000e+00 : f32
    %212 = vector.broadcast %cst_47 : f32 to vector<2x32xf32>
    %213 = arith.addf %212, %211 : vector<2x32xf32>
    %214 = arith.divf %212, %213 : vector<2x32xf32>
    %215 = vector.extract_strided_slice %15 {offsets = [12, 0], sizes = [2, 32], strides = [1, 1]} : vector<16x32xf32> to vector<2x32xf32>
    %216 = vector.extract_strided_slice %198 {offsets = [0, 64], sizes = [2, 32], strides = [1, 1]} : vector<2x96xf32> to vector<2x32xf32>
    %217 = arith.addf %216, %8 : vector<2x32xf32>
    %218 = arith.mulf %206, %217 : vector<2x32xf32>
    %219 = arith.addf %215, %218 : vector<2x32xf32>
    %220 = math.tanh %219 : vector<2x32xf32>
    %cst_48 = arith.constant 1.000000e+00 : f32
    %221 = vector.broadcast %cst_48 : f32 to vector<2x32xf32>
    %222 = arith.subf %221, %214 : vector<2x32xf32>
    %223 = arith.mulf %222, %220 : vector<2x32xf32>
    %224 = arith.mulf %214, %195 : vector<2x32xf32>
    %225 = arith.addf %223, %224 : vector<2x32xf32>
    %c12 = arith.constant 12 : index
    %c0_49 = arith.constant 0 : index
    %226 = vector.load %arg8[%c12, %c0_49] : memref<16x32xf32, #tpu.memory_space<vmem>>, vector<2x32xf32>
    tpu.vector_store %arg8[%c12, %c0_49], %225 {strides = array<i32>} : memref<16x32xf32, #tpu.memory_space<vmem>>, vector<2x32xf32>,
    %227 = arith.truncf %225 : vector<2x32xf32> to vector<2x32xbf16>
    %cst_50 = arith.constant dense<0.000000e+00> : vector<2x96xf32>
    %228 = tpu.matmul %227, %3, %cst_50 {dimension_numbers = #tpu.dot_dimension_numbers<[1], [0], [0], [1], [0, 0, 1, 1], [], []>} : vector<2x32xbf16>, vector<32x96xbf16>, vector<2x96xf32> -> vector<2x96xf32>
    %229 = vector.extract_strided_slice %13 {offsets = [14, 0], sizes = [2, 32], strides = [1, 1]} : vector<16x32xf32> to vector<2x32xf32>
    %230 = vector.extract_strided_slice %228 {offsets = [0, 0], sizes = [2, 32], strides = [1, 1]} : vector<2x96xf32> to vector<2x32xf32>
    %231 = arith.addf %229, %230 : vector<2x32xf32>
    %232 = arith.negf %231 : vector<2x32xf32>
    %233 = math.exp %232 : vector<2x32xf32>
    %cst_51 = arith.constant 1.000000e+00 : f32
    %234 = vector.broadcast %cst_51 : f32 to vector<2x32xf32>
    %235 = arith.addf %234, %233 : vector<2x32xf32>
    %236 = arith.divf %234, %235 : vector<2x32xf32>
    %237 = vector.extract_strided_slice %14 {offsets = [14, 0], sizes = [2, 32], strides = [1, 1]} : vector<16x32xf32> to vector<2x32xf32>
    %238 = vector.extract_strided_slice %228 {offsets = [0, 32], sizes = [2, 32], strides = [1, 1]} : vector<2x96xf32> to vector<2x32xf32>
    %239 = arith.addf %237, %238 : vector<2x32xf32>
    %240 = arith.negf %239 : vector<2x32xf32>
    %241 = math.exp %240 : vector<2x32xf32>
    %cst_52 = arith.constant 1.000000e+00 : f32
    %242 = vector.broadcast %cst_52 : f32 to vector<2x32xf32>
    %243 = arith.addf %242, %241 : vector<2x32xf32>
    %244 = arith.divf %242, %243 : vector<2x32xf32>
    %245 = vector.extract_strided_slice %15 {offsets = [14, 0], sizes = [2, 32], strides = [1, 1]} : vector<16x32xf32> to vector<2x32xf32>
    %246 = vector.extract_strided_slice %228 {offsets = [0, 64], sizes = [2, 32], strides = [1, 1]} : vector<2x96xf32> to vector<2x32xf32>
    %247 = arith.addf %246, %8 : vector<2x32xf32>
    %248 = arith.mulf %236, %247 : vector<2x32xf32>
    %249 = arith.addf %245, %248 : vector<2x32xf32>
    %250 = math.tanh %249 : vector<2x32xf32>
    %cst_53 = arith.constant 1.000000e+00 : f32
    %251 = vector.broadcast %cst_53 : f32 to vector<2x32xf32>
    %252 = arith.subf %251, %244 : vector<2x32xf32>
    %253 = arith.mulf %252, %250 : vector<2x32xf32>
    %254 = arith.mulf %244, %225 : vector<2x32xf32>
    %255 = arith.addf %253, %254 : vector<2x32xf32>
    %c14 = arith.constant 14 : index
    %c0_54 = arith.constant 0 : index
    %256 = vector.load %arg8[%c14, %c0_54] : memref<16x32xf32, #tpu.memory_space<vmem>>, vector<2x32xf32>
    tpu.vector_store %arg8[%c14, %c0_54], %255 {strides = array<i32>} : memref<16x32xf32, #tpu.memory_space<vmem>>, vector<2x32xf32>,
    %c0_55 = arith.constant 0 : index
    %c0_56 = arith.constant 0 : index
    %257 = vector.load %arg8[%c0_55, %c0_56] : memref<16x32xf32, #tpu.memory_space<vmem>>, vector<16x32xf32>
    %258 = arith.truncf %257 : vector<16x32xf32> to vector<16x32xbf16>
    %cst_57 = arith.constant dense<0.000000e+00> : vector<16x1xf32>
    %259 = tpu.matmul %258, %4, %cst_57 {dimension_numbers = #tpu.dot_dimension_numbers<[1], [0], [0], [1], [0, 0, 1, 1], [], []>} : vector<16x32xbf16>, vector<32x1xbf16>, vector<16x1xf32> -> vector<16x1xf32>
    %260 = vector.broadcast %5 : vector<1x1xf32> to vector<16x1xf32>
    %261 = arith.addf %259, %260 : vector<16x1xf32>
    %cst_58 = arith.constant 0.000000e+00 : f32
    %262 = vector.broadcast %cst_58 : f32 to vector<16x1xf32>
    %263 = arith.maximumf %261, %262 : vector<16x1xf32>
    %264 = vector.broadcast %263 : vector<16x1xf32> to vector<16x4xf32>
    %265 = arith.minimumf %264, %0 : vector<16x4xf32>
    %c0_59 = arith.constant 0 : index
    %c0_60 = arith.constant 0 : index
    %266 = vector.load %arg7[%c0_59, %c0_60] : memref<16x4xf32, #tpu.memory_space<vmem>>, vector<16x4xf32>
    tpu.vector_store %arg7[%c0_59, %c0_60], %265 {strides = array<i32>} : memref<16x4xf32, #tpu.memory_space<vmem>>, vector<16x4xf32>,
    return
  }
}

</mosaic_0001>

<bundles_post_ra>
// kernel: custom_rnn_forward.1
= control target key start
LH: loop header
LB: loop body
LE: loop exit
PB: predicated region body
PF: predicated region fallthrough
CT: control target
= control target key end

     0   :  { %vm59_vm0 = vcmask 1041408   ;;  %v1070_v0 = vmov 0.0   ;;  %vm1071_vm1 = vmmov 0   ;;  %v1072_v7 = vmov 0   ;;  %s1073_s11 = smov 64   ;;  %s1335_s2 = inlined_call_operand.vmem [shape: bf16[32,96], index: 2, kind: input, shape index: {}]   ;;  %s1336_s1 = inlined_call_operand.vmem [shape: bf16[4,96], index: 1, kind: input, shape index: {}]   ;;  %s1337_s0 = inlined_call_operand.vmem [shape: f32[16,4], index: 0, kind: input, shape index: {}]   ;;  %s1338_s4 = inlined_call_operand.vmem [shape: f32[1,32], index: 4, kind: input, shape index: {}]   ;;  %s1339_s3 = inlined_call_operand.vmem [shape: f32[1,96], index: 3, kind: input, shape index: {}]   ;;  %s1340_s5 = inlined_call_operand.vmem [shape: bf16[32,1], index: 5, kind: input, shape index: {}]   ;;  %s1341_s6 = inlined_call_operand.<no memory space> [shape: f32[1,1], index: 6, kind: input, shape index: {}]   ;;  %s1342_s7 = inlined_call_operand.vmem [shape: f32[16,4], index: 7, kind: output, shape index: {}]  }
   0x1   :  { %939 = vmatprep.subr.bf16.mxu1 %v1070_v0  ;;  %v1119_v1 = vld [vmem:[%s1335_s2] sm:$0xff]   ;;  %933 = vmatprep.subr.bf16.mxu0 %v1070_v0  ;;  %v1133_v4 = vld [vmem:[%s1335_s2 + $0x8] sm:$0xff]   ;;  %vm55_vm2 = vcmask 31744   ;;  %vm116_vm3 = vcmask 261120   ;;  %vm194_vm4 = vcmask 254976   ;;  %vm367_vm5 = vcmask 259076  }
   0x2   :  { %v32_v2 = vld [vmem:[%s1336_s1] sm:$0x3]  ;;  %935 = vmatprep.mubr.msk.bf16.mxu0 %vm1071_vm1, %v1070_v0  ;;  %943 = vmatprep.mubr.msk.bf16.mxu1 %vm1071_vm1, %v1070_v0  ;;  %v1143_v6 = vld [vmem:[%s1337_s0 + $0x8] sm:$0xff]  ;;  %vm280_vm6 = vcmask 257026   ;;  %vm454_vm7 = vcmask 261126  }
   0x3   :  { %940 = vmatpush3.bf16.msra.mxu1 %v1119_v1  ;;  %v61_v3 = vsel %vm59_vm0, %v32_v2, 0  ;;  %v1138_v5 = vld [vmem:[%s1337_s0] sm:$0xff]  ;;  %1016 = vset.pattern.permute.xlu0 %v1072_v7 }
   0x4   :  { %934 = vmatpush3.bf16.msra.mxu0 %v61_v3  ;;  %941 = vmatprep.subr.bf16.mxu1 %v1070_v0  ;;  %v31_v8 = vpack.c.bf16 %v1143_v6, %v1138_v5  ;;  %v880_v9 = vld [vmem:[%s1338_s4] ss:$0 sm:$0xff] }
   0x5   :  { %167 = vrot.lane.b32.xlu0 %v880_v9, %s1073_s11  ;;  %947 = vmatprep.subr.bf16.mxu0 %v1070_v0  ;;  %v881_v13 = vld [vmem:[%s1339_s3] ss:$0 sm:$0xff]  ;;  %s1074_s3 = smov 96  }
   0x6   :  { %1017 = vset.pattern.permute.xlu1 %v1072_v7 }
   0x7   :  { %942 = vmatpush3.bf16.msra.mxu1 %v1133_v4  ;;  %936 = vmatmul.mubr.msk.bf16.vlgmr.msra.gmra.mrb[0].mxu0 %vm55_vm2, %v31_v8 }
   0x8   :  { %948 = vmatpush3.bf16.msra.mxu0 %v1119_v1  ;;  %951 = vmatprep.mubr.msk.bf16.mxu0 %vm1071_vm1, %v1070_v0 }
   0x9   :  { %949 = vmatprep.subr.bf16.mxu0 %v1070_v0  ;;  %955 = vmatprep.subr.bf16.mxu1 %v1070_v0 }
   0xa   :  { %944 = vmatmul.mubr.bf16.vlgmr.msra.gmra.mrb[0].mxu1 %v1072_v7 }
   0xb   :  { %956 = vmatpush3.bf16.msra.mxu1 %v1119_v1  ;;  %959 = vmatprep.mubr.msk.bf16.mxu1 %vm1071_vm1, %v1070_v0 }
   0xc   :  { %950 = vmatpush3.bf16.msra.mxu0 %v1133_v4  ;;  %957 = vmatprep.subr.bf16.mxu1 %v1070_v0 }
   0xd   :  { %963 = vmatprep.subr.bf16.mxu0 %v1070_v0 }
   0xf   :  { %958 = vmatpush3.bf16.msra.mxu1 %v1133_v4 }
  0x10   :  { %971 = vmatprep.subr.bf16.mxu1 %v1070_v0 }
  0x77   :  { %v1168_v11 = vpop.permute.xlu0 %167 }
  0xda   :  { %v97_v10 = vpop.f32.mrb[0].mxu0 }
  0xdb   :  { %v937_v12 = vpop.f32.mrb[1].mxu0  ;;  %v1177_v22 = vadd.f32 %v881_v13, %v97_v10 }
  0xdc   :  { %v100_v14 = vpop.f32.mrb[2].mxu0 }
  0xdd   :  { %v154_v15 = vpop.f32.mrb[0].mxu1  ;;  %v1173_v16 = vadd.f32 %v881_v13, %v100_v14  ;;  %v938_v17 = vpop.f32.mrb[3].mxu0 }
  0xde   :  { %v170_v18 = vadd.f32 %v1168_v11, %v154_v15  ;;  %v945_v19 = vpop.f32.mrb[1].mxu1  ;;  %v160_v23 = vadd.f32 %v154_v15, %v1177_v22 }
  0xdf   :  { %v157_v20 = vpop.f32.mrb[2].mxu1 }
  0xe0   :  { %172 = vrot.lane.b32.xlu0 %v170_v18, %s1073_s11  ;;  %v946_v21 = vpop.f32.mrb[3].mxu1  ;;  %v885_v24 = vmul.f32 -1.442695, %v160_v23 }
  0xe2   :  { %1022 = vpow2.f32 %v885_v24 }
  0xec   :  { %v1023_v25 = vpop.eup %1022 }
  0xed   :  { %v164_v26 = vadd.f32 1.0, %v1023_v25 }
  0xef   :  { %1024 = vrcp.f32 %v164_v26 }
  0xf9   :  { %v1025_v27 = vpop.eup %1024 }
  0xfa   :  { %v182_v33 = vsub.f32 1.0, %v1025_v27  ;;  %v188_v35 = vmul.f32 0.0, %v1025_v27 }
 0x152   :  { %v173_v28 = vpop.permute.xlu0 %172 }
 0x153   :  { %v175_v29 = vmul.f32 %v1025_v27, %v173_v28 }
 0x155   :  { %177 = vrot.lane.b32.xlu1 %v175_v29, %s1073_s11 }
 0x1c7   :  { %v178_v30 = vpop.permute.xlu1 %177 }
 0x1c8   :  { %v180_v31 = vadd.f32 %v178_v30, %v1177_v22 }
 0x1ca   :  { %1026 = vtanh.f32 %v180_v31 }
 0x1d4   :  { %v1027_v32 = vpop.eup %1026 }
 0x1d5   :  { %184 = vrot.lane.b32.xlu1 %v1027_v32, %s1074_s3 }
 0x247   :  { %v185_v34 = vpop.permute.xlu1 %184 }
 0x248   :  { %v187_v36 = vmul.f32 %v185_v34, %v182_v33 }
 0x24a   :  { %v1183_v37 = vadd.f32 %v188_v35, %v187_v36 }
 0x24c   :  { %v196_v38 = vpack.c.bf16 %v1183_v37, %v1183_v37  ;;  %v272_v58 = vrot.slane %v1183_v37, 6 }
 0x24e   :  { %198 = vrot.lane.b32.xlu0 %v196_v38, %s1074_s3 }
 0x2c0   :  { %v199_v39 = vpop.permute.xlu0 %198 }
 0x2c1   :  { %952 = vmatmul.mubr.msk.bf16.vlgmr.msra.gmra.mrb[4].mxu0 %vm116_vm3, %v199_v39 }
 0x2c2   :  { %964 = vmatpush3.bf16.msra.mxu0 %v1119_v1  ;;  %967 = vmatprep.mubr.msk.bf16.mxu0 %vm1071_vm1, %v1070_v0 }
 0x2c3   :  { %965 = vmatprep.subr.bf16.mxu0 %v1070_v0 }
 0x2c6   :  { %966 = vmatpush3.bf16.msra.mxu0 %v1133_v4 }
 0x2c7   :  { %979 = vmatprep.subr.bf16.mxu0 %v1070_v0 }
 0x394   :  { %v237_v40 = vpop.f32.mrb[4].mxu0 }
 0x395   :  { %v253_v41 = vadd.f32 %v237_v40, %v1168_v11  ;;  %v953_v42 = vpop.f32.mrb[5].mxu0  ;;  %v244_v46 = vrot.slane %v237_v40, 6 }
 0x396   :  { %v240_v43 = vpop.f32.mrb[6].mxu0 }
 0x397   :  { %v255_v44 = vrot.slane %v253_v41, 6  ;;  %v954_v45 = vpop.f32.mrb[7].mxu0  ;;  %v246_v47 = vadd.f32 %v244_v46, %v1177_v22 }
 0x399   :  { %256 = vrot.lane.b32.xlu1 %v255_v44, %s1073_s11  ;;  %v887_v48 = vmul.f32 -1.442695, %v246_v47 }
 0x39b   :  { %1028 = vpow2.f32 %v887_v48 }
 0x3a5   :  { %v1029_v49 = vpop.eup %1028 }
 0x3a6   :  { %v250_v50 = vadd.f32 1.0, %v1029_v49 }
 0x3a8   :  { %1030 = vrcp.f32 %v250_v50 }
 0x3b2   :  { %v1031_v51 = vpop.eup %1030 }
 0x3b3   :  { %v266_v57 = vsub.f32 1.0, %v1031_v51  ;;  %v274_v60 = vmul.f32 %v1031_v51, %v272_v58 }
 0x40b   :  { %v257_v52 = vpop.permute.xlu1 %256 }
 0x40c   :  { %v259_v53 = vmul.f32 %v1031_v51, %v257_v52 }
 0x40e   :  { %261 = vrot.lane.b32.xlu0 %v259_v53, %s1073_s11 }
 0x480   :  { %v262_v54 = vpop.permute.xlu0 %261 }
 0x481   :  { %v264_v55 = vadd.f32 %v262_v54, %v1177_v22 }
 0x483   :  { %1032 = vtanh.f32 %v264_v55 }
 0x48d   :  { %v1033_v56 = vpop.eup %1032 }
 0x48e   :  { %268 = vrot.lane.b32.xlu1 %v1033_v56, %s1074_s3 }
 0x500   :  { %v269_v59 = vpop.permute.xlu1 %268 }
 0x501   :  { %v271_v61 = vmul.f32 %v269_v59, %v266_v57 }
 0x503   :  { %v1202_v62 = vadd.f32 %v274_v60, %v271_v61 }
 0x505   :  { %v282_v63 = vpack.c.bf16 %v1202_v62, %v1202_v62  ;;  %v359_v28 = vrot.slane %v1202_v62, 6 }
 0x507   :  { %v284_v2 = vrot.slane %v282_v63, 1 }
 0x509   :  { %285 = vrot.lane.b32.xlu0 %v284_v2, %s1074_s3 }
 0x57b   :  { %v286_v3 = vpop.permute.xlu0 %285 }
 0x57c   :  { %960 = vmatmul.mubr.msk.bf16.vlgmr.msra.gmra.mrb[4].mxu1 %vm116_vm3, %v286_v3 }
 0x57d   :  { %972 = vmatpush3.bf16.msra.mxu1 %v1119_v1  ;;  %975 = vmatprep.mubr.msk.bf16.mxu1 %vm1071_vm1, %v1070_v0 }
 0x57e   :  { %973 = vmatprep.subr.bf16.mxu1 %v1070_v0 }
 0x581   :  { %974 = vmatpush3.bf16.msra.mxu1 %v1133_v4 }
 0x582   :  { %987 = vmatprep.subr.bf16.mxu1 %v1070_v0 }
 0x64f   :  { %v324_v7 = vpop.f32.mrb[4].mxu1 }
 0x650   :  { %v340_v8 = vadd.f32 %v324_v7, %v1168_v11  ;;  %v961_v9 = vpop.f32.mrb[5].mxu1  ;;  %v331_v14 = vrot.slane %v324_v7, 4 }
 0x651   :  { %v327_v10 = vpop.f32.mrb[6].mxu1 }
 0x652   :  { %v342_v12 = vrot.slane %v340_v8, 4  ;;  %v962_v13 = vpop.f32.mrb[7].mxu1  ;;  %v333_v15 = vadd.f32 %v331_v14, %v1177_v22 }
 0x654   :  { %343 = vrot.lane.b32.xlu1 %v342_v12, %s1073_s11  ;;  %v889_v17 = vmul.f32 -1.442695, %v333_v15 }
 0x656   :  { %1034 = vpow2.f32 %v889_v17 }
 0x660   :  { %v1035_v18 = vpop.eup %1034 }
 0x661   :  { %v337_v19 = vadd.f32 1.0, %v1035_v18 }
 0x663   :  { %1036 = vrcp.f32 %v337_v19 }
 0x66d   :  { %v1037_v20 = vpop.eup %1036 }
 0x66e   :  { %v353_v27 = vsub.f32 1.0, %v1037_v20  ;;  %v361_v30 = vmul.f32 %v1037_v20, %v359_v28 }
 0x6c6   :  { %v344_v21 = vpop.permute.xlu1 %343 }
 0x6c7   :  { %v346_v23 = vmul.f32 %v1037_v20, %v344_v21 }
 0x6c9   :  { %348 = vrot.lane.b32.xlu0 %v346_v23, %s1073_s11 }
 0x73b   :  { %v349_v24 = vpop.permute.xlu0 %348 }
 0x73c   :  { %v351_v25 = vadd.f32 %v349_v24, %v1177_v22 }
 0x73e   :  { %1038 = vtanh.f32 %v351_v25 }
 0x748   :  { %v1039_v26 = vpop.eup %1038 }
 0x749   :  { %355 = vrot.lane.b32.xlu1 %v1039_v26, %s1074_s3 }
 0x7bb   :  { %v356_v29 = vpop.permute.xlu1 %355 }
 0x7bc   :  { %v358_v31 = vmul.f32 %v356_v29, %v353_v27 }
 0x7be   :  { %v1221_v32 = vadd.f32 %v361_v30, %v358_v31 }
 0x7c0   :  { %v369_v33 = vpack.c.bf16 %v1221_v32, %v1221_v32  ;;  %v446_v55 = vrot.slane %v1221_v32, 6 }
 0x7c2   :  { %v371_v34 = vrot.slane %v369_v33, 2 }
 0x7c4   :  { %372 = vrot.lane.b32.xlu0 %v371_v34, %s1074_s3 }
 0x836   :  { %v373_v35 = vpop.permute.xlu0 %372 }
 0x837   :  { %968 = vmatmul.mubr.msk.bf16.vlgmr.msra.gmra.mrb[8].mxu0 %vm116_vm3, %v373_v35 }
 0x838   :  { %980 = vmatpush3.bf16.msra.mxu0 %v1119_v1  ;;  %983 = vmatprep.mubr.msk.bf16.mxu0 %vm1071_vm1, %v1070_v0 }
 0x839   :  { %981 = vmatprep.subr.bf16.mxu0 %v1070_v0 }
 0x83c   :  { %982 = vmatpush3.bf16.msra.mxu0 %v1133_v4 }
 0x83d   :  { %995 = vmatprep.subr.bf16.mxu0 %v1070_v0 }
 0x90a   :  { %v411_v36 = vpop.f32.mrb[8].mxu0 }
 0x90b   :  { %v427_v38 = vadd.f32 %v411_v36, %v1168_v11  ;;  %v969_v39 = vpop.f32.mrb[9].mxu0  ;;  %v418_v43 = vrot.slane %v411_v36, 2 }
 0x90c   :  { %v414_v40 = vpop.f32.mrb[10].mxu0 }
 0x90d   :  { %v429_v41 = vrot.slane %v427_v38, 2  ;;  %v970_v42 = vpop.f32.mrb[11].mxu0  ;;  %v420_v44 = vadd.f32 %v418_v43, %v1177_v22 }
 0x90f   :  { %430 = vrot.lane.b32.xlu1 %v429_v41, %s1073_s11  ;;  %v891_v45 = vmul.f32 -1.442695, %v420_v44 }
 0x911   :  { %1040 = vpow2.f32 %v891_v45 }
 0x91b   :  { %v1041_v46 = vpop.eup %1040 }
 0x91c   :  { %v424_v47 = vadd.f32 1.0, %v1041_v46 }
 0x91e   :  { %1042 = vrcp.f32 %v424_v47 }
 0x928   :  { %v1043_v48 = vpop.eup %1042 }
 0x929   :  { %v440_v54 = vsub.f32 1.0, %v1043_v48  ;;  %v448_v57 = vmul.f32 %v1043_v48, %v446_v55 }
 0x981   :  { %v431_v49 = vpop.permute.xlu1 %430 }
 0x982   :  { %v433_v50 = vmul.f32 %v1043_v48, %v431_v49 }
 0x984   :  { %435 = vrot.lane.b32.xlu0 %v433_v50, %s1073_s11 }
 0x9f6   :  { %v436_v51 = vpop.permute.xlu0 %435 }
 0x9f7   :  { %v438_v52 = vadd.f32 %v436_v51, %v1177_v22 }
 0x9f9   :  { %1044 = vtanh.f32 %v438_v52 }
 0xa03   :  { %v1045_v53 = vpop.eup %1044 }
 0xa04   :  { %442 = vrot.lane.b32.xlu1 %v1045_v53, %s1074_s3 }
 0xa76   :  { %v443_v56 = vpop.permute.xlu1 %442 }
 0xa77   :  { %v445_v58 = vmul.f32 %v443_v56, %v440_v54 }
 0xa79   :  { %v1240_v59 = vadd.f32 %v448_v57, %v445_v58 }
 0xa7b   :  { %v456_v60 = vpack.c.bf16 %v1240_v59, %v1240_v59  ;;  %v529_v23 = vrot.slane %v1240_v59, 6 }
 0xa7d   :  { %v458_v61 = vrot.slane %v456_v60, 3 }
 0xa7f   :  { %459 = vrot.lane.b32.xlu0 %v458_v61, %s1074_s3 }
 0xaf1   :  { %v460_v63 = vpop.permute.xlu0 %459 }
 0xaf2   :  { %976 = vmatmul.mubr.msk.bf16.vlgmr.msra.gmra.mrb[8].mxu1 %vm116_vm3, %v460_v63 }
 0xaf3   :  { %988 = vmatpush3.bf16.msra.mxu1 %v1119_v1  ;;  %991 = vmatprep.mubr.msk.bf16.mxu1 %vm1071_vm1, %v1070_v0 }
 0xaf4   :  { %989 = vmatprep.subr.bf16.mxu1 %v1070_v0 }
 0xaf7   :  { %990 = vmatpush3.bf16.msra.mxu1 %v1133_v4 }
 0xaf8   :  { %1003 = vmatprep.subr.bf16.mxu1 %v1070_v0 }
 0xbc5   :  { %v498_v22 = vpop.f32.mrb[8].mxu1 }
 0xbc6   :  { %v511_v2 = vadd.f32 %v498_v22, %v1168_v11  ;;  %v977_v3 = vpop.f32.mrb[9].mxu1  ;;  %v504_v9 = vadd.f32 %v498_v22, %v1173_v16 }
 0xbc7   :  { %v501_v7 = vpop.f32.mrb[10].mxu1 }
 0xbc8   :  { %513 = vrot.lane.b32.xlu1 %v511_v2, %s1073_s11  ;;  %v978_v8 = vpop.f32.mrb[11].mxu1  ;;  %v893_v10 = vmul.f32 -1.442695, %v504_v9 }
 0xbca   :  { %1046 = vpow2.f32 %v893_v10 }
 0xbd4   :  { %v1047_v12 = vpop.eup %1046 }
 0xbd5   :  { %v508_v13 = vadd.f32 1.0, %v1047_v12 }
 0xbd7   :  { %1048 = vrcp.f32 %v508_v13 }
 0xbe1   :  { %v1049_v14 = vpop.eup %1048 }
 0xbe2   :  { %v523_v21 = vsub.f32 1.0, %v1049_v14  ;;  %v531_v25 = vmul.f32 %v1049_v14, %v529_v23 }
 0xc3a   :  { %v514_v15 = vpop.permute.xlu1 %513 }
 0xc3b   :  { %v516_v17 = vmul.f32 %v1049_v14, %v514_v15 }
 0xc3d   :  { %518 = vrot.lane.b32.xlu0 %v516_v17, %s1073_s11 }
 0xcaf   :  { %v519_v18 = vpop.permute.xlu0 %518 }
 0xcb0   :  { %v521_v19 = vadd.f32 %v519_v18, %v1173_v16 }
 0xcb2   :  { %1050 = vtanh.f32 %v521_v19 }
 0xcbc   :  { %v1051_v20 = vpop.eup %1050 }
 0xcbd   :  { %525 = vrot.lane.b32.xlu1 %v1051_v20, %s1074_s3 }
 0xd2f   :  { %v526_v24 = vpop.permute.xlu1 %525 }
 0xd30   :  { %v528_v26 = vmul.f32 %v526_v24, %v523_v21 }
 0xd32   :  { %v1259_v27 = vadd.f32 %v531_v25, %v528_v26 }
 0xd34   :  { %v538_v28 = vpack.c.bf16 %v1259_v27, %v1259_v27  ;;  %v614_v48 = vrot.slane %v1259_v27, 6 }
 0xd36   :  { %540 = vrot.lane.b32.xlu0 %v538_v28, %s1074_s3 }
 0xda8   :  { %v541_v29 = vpop.permute.xlu0 %540 }
 0xda9   :  { %984 = vmatmul.mubr.msk.bf16.vlgmr.msra.gmra.mrb[12].mxu0 %vm116_vm3, %v541_v29 }
 0xdaa   :  { %996 = vmatpush3.bf16.msra.mxu0 %v1119_v1  ;;  %999 = vmatprep.mubr.msk.bf16.mxu0 %vm1071_vm1, %v1070_v0 }
 0xdab   :  { %997 = vmatprep.subr.bf16.mxu0 %v1070_v0 }
 0xdae   :  { %998 = vmatpush3.bf16.msra.mxu0 %v1133_v4 }
 0xe7c   :  { %v579_v30 = vpop.f32.mrb[12].mxu0 }
 0xe7d   :  { %v595_v31 = vadd.f32 %v579_v30, %v1168_v11  ;;  %v985_v33 = vpop.f32.mrb[13].mxu0  ;;  %v586_v38 = vrot.slane %v579_v30, 6 }
 0xe7e   :  { %v582_v34 = vpop.f32.mrb[14].mxu0 }
 0xe7f   :  { %v597_v35 = vrot.slane %v595_v31, 6  ;;  %v986_v36 = vpop.f32.mrb[15].mxu0  ;;  %v588_v39 = vadd.f32 %v586_v38, %v1173_v16 }
 0xe81   :  { %598 = vrot.lane.b32.xlu1 %v597_v35, %s1073_s11  ;;  %v895_v1 = vmul.f32 -1.442695, %v588_v39 }
 0xe83   :  { %1052 = vpow2.f32 %v895_v1 }
 0xe8d   :  { %v1053_v40 = vpop.eup %1052 }
 0xe8e   :  { %v592_v41 = vadd.f32 1.0, %v1053_v40 }
 0xe90   :  { %1054 = vrcp.f32 %v592_v41 }
 0xe9a   :  { %v1055_v42 = vpop.eup %1054 }
 0xe9b   :  { %v608_v47 = vsub.f32 1.0, %v1055_v42  ;;  %v616_v50 = vmul.f32 %v1055_v42, %v614_v48 }
 0xef3   :  { %v599_v43 = vpop.permute.xlu1 %598 }
 0xef4   :  { %v601_v4 = vmul.f32 %v1055_v42, %v599_v43 }
 0xef6   :  { %603 = vrot.lane.b32.xlu0 %v601_v4, %s1073_s11 }
 0xf68   :  { %v604_v44 = vpop.permute.xlu0 %603 }
 0xf69   :  { %v606_v45 = vadd.f32 %v604_v44, %v1173_v16 }
 0xf6b   :  { %1056 = vtanh.f32 %v606_v45 }
 0xf75   :  { %v1057_v46 = vpop.eup %1056 }
 0xf76   :  { %610 = vrot.lane.b32.xlu1 %v1057_v46, %s1074_s3 }
 0xfe8   :  { %v611_v49 = vpop.permute.xlu1 %610 }
 0xfe9   :  { %v613_v51 = vmul.f32 %v611_v49, %v608_v47 }
 0xfeb   :  { %v1277_v52 = vadd.f32 %v616_v50, %v613_v51  ;;  %v12_v50 = vstv %s1341_s6 }
 0xfec   :  { %13 = vst [vmem:[#allocation3] sm:$0x1] %v12_v50 }
 0xfed   :  { %v623_v53 = vpack.c.bf16 %v1277_v52, %v1277_v52  ;;  %v700_v18 = vrot.slane %v1277_v52, 6 }
 0xfef   :  { %v625_v54 = vrot.slane %v623_v53, 1 }
 0xff1   :  { %626 = vrot.lane.b32.xlu0 %v625_v54, %s1074_s3 }
0x1063   :  { %v627_v55 = vpop.permute.xlu0 %626 }
0x1064   :  { %992 = vmatmul.mubr.msk.bf16.vlgmr.msra.gmra.mrb[12].mxu1 %vm116_vm3, %v627_v55 }
0x1065   :  { %1007 = vmatprep.mubr.msk.bf16.mxu1 %vm1071_vm1, %v1070_v0 }
0x1137   :  { %v665_v56 = vpop.f32.mrb[12].mxu1 }
0x1138   :  { %v681_v57 = vadd.f32 %v665_v56, %v1168_v11  ;;  %v993_v58 = vpop.f32.mrb[13].mxu1  ;;  %v672_v22 = vrot.slane %v665_v56, 4 }
0x1139   :  { %v668_v60 = vpop.f32.mrb[14].mxu1 }
0x113a   :  { %v683_v61 = vrot.slane %v681_v57, 4  ;;  %v994_v63 = vpop.f32.mrb[15].mxu1  ;;  %v674_v2 = vadd.f32 %v672_v22, %v1173_v16  ;;  %v900_v57 = vld [vmem:[#allocation3] ss:$0 sm:$0xff] }
0x113c   :  { %684 = vrot.lane.b32.xlu1 %v683_v61, %s1073_s11  ;;  %v897_v3 = vmul.f32 -1.442695, %v674_v2 }
0x113e   :  { %1058 = vpow2.f32 %v897_v3 }
0x1148   :  { %v1059_v7 = vpop.eup %1058 }
0x1149   :  { %v678_v8 = vadd.f32 1.0, %v1059_v7 }
0x114b   :  { %1060 = vrcp.f32 %v678_v8 }
0x1155   :  { %v1061_v9 = vpop.eup %1060 }
0x1156   :  { %v694_v17 = vsub.f32 1.0, %v1061_v9  ;;  %v702_v20 = vmul.f32 %v1061_v9, %v700_v18 }
0x11ae   :  { %v685_v10 = vpop.permute.xlu1 %684 }
0x11af   :  { %v687_v12 = vmul.f32 %v1061_v9, %v685_v10 }
0x11b1   :  { %689 = vrot.lane.b32.xlu0 %v687_v12, %s1073_s11 }
0x1223   :  { %v690_v13 = vpop.permute.xlu0 %689 }
0x1224   :  { %v692_v14 = vadd.f32 %v690_v13, %v1173_v16 }
0x1226   :  { %1062 = vtanh.f32 %v692_v14 }
0x1230   :  { %v1063_v15 = vpop.eup %1062 }
0x1231   :  { %696 = vrot.lane.b32.xlu1 %v1063_v15, %s1074_s3 }
0x12a3   :  { %v697_v19 = vpop.permute.xlu1 %696 }
0x12a4   :  { %v699_v21 = vmul.f32 %v697_v19, %v694_v17 }
0x12a6   :  { %v703_v23 = vadd.f32 %v702_v20, %v699_v21 }
0x12a8   :  { %v709_v24 = vpack.c.bf16 %v703_v23, %v703_v23  ;;  %v786_v47 = vrot.slane %v703_v23, 6 }
0x12aa   :  { %v711_v25 = vrot.slane %v709_v24, 2 }
0x12ac   :  { %712 = vrot.lane.b32.xlu0 %v711_v25, %s1074_s3 }
0x131e   :  { %v713_v26 = vpop.permute.xlu0 %712 }
0x131f   :  { %1000 = vmatmul.mubr.msk.bf16.vlgmr.msra.gmra.mrb[16].mxu0 %vm116_vm3, %v713_v26 }
0x13f2   :  { %v751_v28 = vpop.f32.mrb[16].mxu0 }
0x13f3   :  { %v767_v29 = vadd.f32 %v751_v28, %v1168_v11  ;;  %v1001_v30 = vpop.f32.mrb[17].mxu0  ;;  %v758_v35 = vrot.slane %v751_v28, 2 }
0x13f4   :  { %v754_v31 = vpop.f32.mrb[18].mxu0 }
0x13f5   :  { %v769_v33 = vrot.slane %v767_v29, 2  ;;  %v1002_v34 = vpop.f32.mrb[19].mxu0  ;;  %v760_v36 = vadd.f32 %v758_v35, %v1173_v16 }
0x13f7   :  { %770 = vrot.lane.b32.xlu1 %v769_v33, %s1073_s11  ;;  %v899_v38 = vmul.f32 -1.442695, %v760_v36 }
0x13f9   :  { %1064 = vpow2.f32 %v899_v38 }
0x1403   :  { %v1065_v39 = vpop.eup %1064 }
0x1404   :  { %v764_v1 = vadd.f32 1.0, %v1065_v39 }
0x1406   :  { %1066 = vrcp.f32 %v764_v1 }
0x1410   :  { %v1067_v40 = vpop.eup %1066 }
0x1411   :  { %v780_v46 = vsub.f32 1.0, %v1067_v40  ;;  %v788_v48 = vmul.f32 %v1067_v40, %v786_v47 }
0x1469   :  { %v771_v41 = vpop.permute.xlu1 %770 }
0x146a   :  { %v773_v42 = vmul.f32 %v1067_v40, %v771_v41 }
0x146c   :  { %775 = vrot.lane.b32.xlu0 %v773_v42, %s1073_s11 }
0x1470   :  { %191 = vrot.lane.b32.xlu0 %v1183_v37, %s1074_s3 }
0x1474   :  { %364 = vrot.lane.b32.xlu0 %v1221_v32, %s1074_s3 }
0x1478   :  { %534 = vrot.lane.b32.xlu0 %v1259_v27, %s1074_s3  ;;  %v1021_v27 = vld [vmem:[%s1340_s5 + $0x8] sm:$0xff]  }
0x147c   :  { %705 = vrot.lane.b32.xlu0 %v703_v23, %s1074_s3 }
0x14de   :  { %v776_v11 = vpop.permute.xlu0 %775 }
0x14df   :  { %v778_v43 = vadd.f32 %v776_v11, %v1173_v16  ;;  %v1020_v16 = vld [vmem:[%s1340_s5] sm:$0xff]  }
0x14e0   :  { %1004 = vmatpush3.bf16.msra.mxu1 %v1020_v16 }
0x14e1   :  { %1068 = vtanh.f32 %v778_v43  ;;  %1005 = vmatprep.subr.bf16.mxu1 %v1070_v0 }
0x14e2   :  { %v192_v4 = vpop.permute.xlu0 %191 }
0x14e3   :  { %195 = vst.msk [vmem:[#allocation2] sm:$0x3] %vm194_vm4, %v192_v4 }
0x14e4   :  { %1006 = vmatpush3.bf16.msra.mxu1 %v1021_v27 }
0x14e6   :  { %v365_v44 = vpop.permute.xlu0 %364 }
0x14e7   :  { %368 = vst.msk [vmem:[#allocation2] sm:$0x30] %vm367_vm5, %v365_v44 }
0x14ea   :  { %v535_v45 = vpop.permute.xlu0 %534 }
0x14eb   :  { %v1069_v37 = vpop.eup %1068  ;;  %537 = vst.msk [vmem:[#allocation2 + $0x8] sm:$0x3] %vm194_vm4, %v535_v45 }
0x14ec   :  { %782 = vrot.lane.b32.xlu1 %v1069_v37, %s1074_s3 }
0x14ee   :  { %v706_v32 = vpop.permute.xlu0 %705 }
0x14ef   :  { %708 = vst.msk [vmem:[#allocation2 + $0x8] sm:$0x30] %vm367_vm5, %v706_v32 }
0x14f0   :  { %277 = vrot.lane.b32.xlu1 %v1202_v62, %s1074_s3 }
0x14f4   :  { %451 = vrot.lane.b32.xlu1 %v1240_v59, %s1074_s3 }
0x14f8   :  { %619 = vrot.lane.b32.xlu1 %v1277_v52, %s1074_s3 }
0x155e   :  { %v783_v62 = vpop.permute.xlu1 %782 }
0x155f   :  { %v785_v59 = vmul.f32 %v783_v62, %v780_v46 }
0x1561   :  { %v789_v49 = vadd.f32 %v788_v48, %v785_v59 }
0x1562   :  { %v278_v51 = vpop.permute.xlu1 %277 }
0x1563   :  { %281 = vst.msk [vmem:[#allocation2] sm:$0xc] %vm280_vm6, %v278_v51  ;;  %791 = vrot.lane.b32.xlu1 %v789_v49, %s1074_s3 }
0x1566   :  { %v452_v52 = vpop.permute.xlu1 %451 }
0x1567   :  { %455 = vst.msk [vmem:[#allocation2] sm:$0xc0] %vm454_vm7, %v452_v52 }
0x156a   :  { %v620_v0 = vpop.permute.xlu1 %619 }
0x156b   :  { %622 = vst.msk [vmem:[#allocation2 + $0x8] sm:$0xc] %vm280_vm6, %v620_v0 }
0x156e   :  { %v795_v54 = vld [vmem:[#allocation2] sm:$0xff] }
0x15d5   :  { %v792_v53 = vpop.permute.xlu1 %791 }
0x15d6   :  { %794 = vst.msk [vmem:[#allocation2 + $0x8] sm:$0xc0] %vm454_vm7, %v792_v53 }
0x15dd   :  { %v796_v55 = vld [vmem:[#allocation2 + $0x8] sm:$0xff] }
0x15de   :  { %v797_v56 = vpack.c.bf16 %v796_v55, %v795_v54 }
0x15e0   :  { %1008 = vmatmul.mubr.msk.bf16.vlgmr.msra.gmra.mrb[16].mxu1 %vm116_vm3, %v797_v56 }
0x16b3   :  { %v853_v58 = vpop.f32.mrb[16].mxu1 }
0x16b4   :  { %v854_v60 = vadd.f32 %v900_v57, %v853_v58  ;;  %v1009_v61 = vpop.f32.mrb[17].mxu1 }
0x16b5   :  { %v856_v63 = vpop.f32.mrb[18].mxu1 }
0x16b6   :  { %v860_v22 = vmax.f32 %v854_v60, 0.0  ;;  %v857_v2 = vadd.f32 %v900_v57, %v856_v63  ;;  %v1010_v3 = vpop.f32.mrb[19].mxu1 }
0x16b8   :  { %v861_v7 = vmax.f32 %v857_v2, 0.0  ;;  %864 = vperm.xlu0 %1016, %v860_v22  }
0x16ba   :  { %869 = vperm.xlu1 %1017, %v861_v7  }
0x1737   :  { %v865_v8 = vpop.permute.xlu0 %864 }
0x1738   :  { %v872_v9 = vmin.f32 %v865_v8, %v1138_v5 }
0x1739   :  { %v870_v10 = vpop.permute.xlu1 %869 }
0x173a   :  { %874 = vst.msk [vmem:[%s1342_s7] sm:$0xff] %vm55_vm2, %v872_v9  ;;  %v873_v12 = vmin.f32 %v870_v10, %v1143_v6 }
0x173c   :  { %875 = vst.msk [vmem:[%s1342_s7 + $0x8] sm:$0xff] %vm55_vm2, %v873_v12 }

</bundles_post_ra>
